<compile_context>
chip_gen: v7x
topology: tpu7x:2x2x1
jax: 0.10.0
libtpu: 0.0.40
codegen_flags: <defaults>
</compile_context>

<pallas_src>
import functools
import math

import jax
import jax.numpy as jnp
from jax import lax
from jax.experimental import pallas as pl
from jax.experimental.pallas import tpu as pltpu

_LANES = 128              # TPU lane width
_MAX_BLOCK_PACKED = 256   # packed rows per grid step (= 1024 original rows at D=32)
_SUB_PACKED = 32          # packed rows per inner MXU sub-tile (= 128 original rows)


def _mlp_kernel(x_ref, wfc_ref, wproj_ref, o_ref, *, sub_rows):
    """One (block_packed, Dp) slab of c_proj(relu(c_fc(x))^2), sub-tiled."""
    wfc = wfc_ref[...]       # (Dp, Hp) bf16, VMEM-resident block-diagonal c_fc
    wproj = wproj_ref[...]   # (Hp, Dp) bf16, VMEM-resident block-diagonal c_proj
    n_sub = x_ref.shape[0] // sub_rows

    def body(s, carry):
        r0 = pl.multiple_of(s * sub_rows, sub_rows)
        rs = pl.ds(r0, sub_rows)
        xt = x_ref[rs, :].astype(jnp.bfloat16)                      # (S, Dp)
        h = jnp.dot(xt, wfc, preferred_element_type=jnp.float32)    # (S, Hp) f32
        h = jnp.maximum(h, 0.0)
        hq = (h * h).astype(jnp.bfloat16)                           # relu(h)^2
        y = jnp.dot(hq, wproj, preferred_element_type=jnp.float32)  # (S, Dp) f32
        o_ref[rs, :] = y.astype(o_ref.dtype)
        return carry

    # Unrolled so the LLO scheduler sees the whole block while each sub-tile's
    # intermediates stay within the vreg file (no spills).
    lax.fori_loop(0, n_sub, body, 0, unroll=True)


def _choose_tiles(packed_rows):
    """Pick (block_packed, sub_rows): big DMA blocks, small compute sub-tiles."""
    if packed_rows >= 2 * _SUB_PACKED:
        block = min(_MAX_BLOCK_PACKED, (packed_rows // _SUB_PACKED) * _SUB_PACKED)
        sub = _SUB_PACKED
    elif packed_rows >= 8:
        block = (packed_rows // 8) * 8   # sublane-aligned
        sub = 8
    else:
        block = packed_rows              # full extent (tiny input)
        sub = packed_rows
    return block, sub


def modern_mlp(x, w_fc, w_proj):
    """ModernMLP forward.

    x      : (..., d_model)
    w_fc   : (d_model, 4*d_model)   -- torch weight pre-transposed to (in, out)
    w_proj : (4*d_model, d_model)   -- torch weight pre-transposed to (in, out)
    """
    orig_shape = x.shape
    D = orig_shape[-1]
    H = w_fc.shape[1]
    assert w_fc.shape == (D, H) and w_proj.shape == (H, D)

    rows = math.prod(orig_shape[:-1]) if len(orig_shape) > 1 else 1

    # Lane-dense packing: fold `pack` consecutive rows into one 128-wide lane
    # row (pure row-major reshape, no data movement).  Falls back to pack=1 if
    # D does not divide 128 or the row count is not a multiple of pack.
    if D < _LANES and _LANES % D == 0 and rows % (_LANES // D) == 0:
        pack = _LANES // D
    else:
        pack = 1

    Dp, Hp = pack * D, pack * H
    packed_rows = rows // pack
    xp = x.reshape(packed_rows, Dp)

    # Block-diagonal (kron) weights operate directly on the packed layout, so
    # no in-kernel reshuffle is needed.  Cast to bf16 for single-pass MXU work.
    eye = jnp.eye(pack, dtype=w_fc.dtype)
    wfc_p = jnp.kron(eye, w_fc).astype(jnp.bfloat16)       # (Dp, Hp)
    wproj_p = jnp.kron(eye, w_proj).astype(jnp.bfloat16)   # (Hp, Dp)

    block_packed, sub_rows = _choose_tiles(packed_rows)
    grid = (pl.cdiv(packed_rows, block_packed),)   # ragged last block is OK

    itemsize = jnp.dtype(x.dtype).itemsize
    cost = pl.CostEstimate(
        flops=4 * rows * D * H,          # two matmuls (logical work)
        transcendentals=0,
        bytes_accessed=2 * rows * D * itemsize + 2 * (Dp * Hp + Hp * Dp),
    )

    out = pl.pallas_call(
        functools.partial(_mlp_kernel, sub_rows=sub_rows),
        out_shape=jax.ShapeDtypeStruct((packed_rows, Dp), x.dtype),
        grid=grid,
        in_specs=[
            pl.BlockSpec((block_packed, Dp), lambda i: (i, 0)),  # activations
            pl.BlockSpec((Dp, Hp), lambda i: (0, 0)),            # c_fc (resident)
            pl.BlockSpec((Hp, Dp), lambda i: (0, 0)),            # c_proj (resident)
        ],
        out_specs=pl.BlockSpec((block_packed, Dp), lambda i: (i, 0)),
        compiler_params=pltpu.CompilerParams(
            dimension_semantics=("parallel",)),
        cost_estimate=cost,
        # NOTE: at D=32 total VMEM use is ~1 MiB; if reused with much larger
        # d_model, budget 2x(in+out) blocks + both weights against v7x's 64 MiB
        # and set vmem_limit_bytes explicitly.
    )(xp, wfc_p, wproj_p)

    return out.reshape(orig_shape)


def reference_mlp(x, w_fc, w_proj):
    """Pure-JAX f32 mirror of torch ModernMLP.forward."""
    h = jnp.einsum("...d,df->...f", x, w_fc, precision="highest")
    h = jnp.square(jnp.maximum(h, 0.0))
    return jnp.einsum("...f,fd->...d", h, w_proj, precision="highest")


def init_params(key, D):
    """Synthetic parameters with shapes matching the torch module.

    NOTE: torch zero-inits c_proj.weight; random values are used here so the
    correctness check is non-trivial.
    """
    H = 4 * D
    k1, k2 = jax.random.split(key)
    w_fc = jax.random.normal(k1, (D, H), jnp.float32) / jnp.sqrt(D)
    w_proj = jax.random.normal(k2, (H, D), jnp.float32) * 0.02
    return w_fc, w_proj


def _check(x, w_fc, w_proj):
    out = jax.block_until_ready(modern_mlp(x, w_fc, w_proj))
    ref = jax.block_until_ready(reference_mlp(x, w_fc, w_proj))
    assert out.shape == x.shape, out.shape
    assert bool(jnp.all(jnp.isfinite(out))), "non-finite output"
    max_err = float(jnp.max(jnp.abs(out - ref)))
    rel_err = float(jnp.linalg.norm(out - ref) / (jnp.linalg.norm(ref) + 1e-12))
    # bf16 operands + f32 accumulation => loosened tolerance vs. the old 1e-3.
    assert max_err < 1.5e-1 and rel_err < 3e-2, (max_err, rel_err)


if __name__ == "__main__":
    # Shapes consistent with the decoder hosting ModernMLP:
    # batch=2, seq=8, d_model=32 -> hidden = 4*d_model = 128.
    B, T, D = 2, 8, 32

    key = jax.random.PRNGKey(0)
    k_x, k_p, k_x2 = jax.random.split(key, 3)
    w_fc, w_proj = init_params(k_p, D)

    x = jax.random.normal(k_x, (B, T, D), jnp.float32)
    _check(x, w_fc, w_proj)

    # Slightly larger case exercising a multi-step grid with a ragged last
    # block (no wrapper-side padding).
    x2 = jax.random.normal(k_x2, (2, 100, D), jnp.float32)
    _check(x2, w_fc, w_proj)

    print("KERNEL_OK")
</pallas_src>

<mosaic_0001>
module attributes {stable_mosaic.version = 11 : i64} {
  func.func @_mlp_kernel(%arg0: i32, %arg1: memref<4x128xf32, #tpu.memory_space<vmem>>, %arg2: memref<128x512xbf16, #tpu.memory_space<vmem>>, %arg3: memref<512x128xbf16, #tpu.memory_space<vmem>>, %arg4: memref<4x128xf32, #tpu.memory_space<vmem>>) attributes {dimension_semantics = [#tpu.dimension_semantics<parallel>], iteration_bounds = array<i64: 1>, scalar_prefetch = 0 : i64, scratch_operands = 0 : i64, tpu.core_type = #tpu.core_type<tc>, window_params = [{transform_indices = @transform_0, window_bounds = array<i64: 4, 128>}, {pipeline_mode = #tpu.pipeline_mode<synchronous>, transform_indices = @transform_1, window_bounds = array<i64: 128, 512>}, {pipeline_mode = #tpu.pipeline_mode<synchronous>, transform_indices = @transform_2, window_bounds = array<i64: 512, 128>}, {transform_indices = @transform_3, window_bounds = array<i64: 4, 128>}]} {
    %c0 = arith.constant 0 : index
    %c0_0 = arith.constant 0 : index
    %0 = vector.load %arg2[%c0, %c0_0] : memref<128x512xbf16, #tpu.memory_space<vmem>>, vector<128x512xbf16>
    %c0_1 = arith.constant 0 : index
    %c0_2 = arith.constant 0 : index
    %1 = vector.load %arg3[%c0_1, %c0_2] : memref<512x128xbf16, #tpu.memory_space<vmem>>, vector<512x128xbf16>
    %c0_i32 = arith.constant 0 : i32
    %c4_i32 = arith.constant 4 : i32
    %2 = arith.muli %c0_i32, %c4_i32 : i32
    %3 = tpu.assume_multiple %2, 4 : i32
    %4 = arith.index_cast %3 : i32 to index
    %c0_3 = arith.constant 0 : index
    %5 = vector.load %arg1[%4, %c0_3] : memref<4x128xf32, #tpu.memory_space<vmem>>, vector<4x128xf32>
    %6 = arith.truncf %5 : vector<4x128xf32> to vector<4x128xbf16>
    %cst = arith.constant dense<0.000000e+00> : vector<4x512xf32>
    %7 = tpu.matmul %6, %0, %cst {dimension_numbers = #tpu.dot_dimension_numbers<[1], [0], [0], [1], [0, 0, 1, 1], [], []>} : vector<4x128xbf16>, vector<128x512xbf16>, vector<4x512xf32> -> vector<4x512xf32>
    %cst_4 = arith.constant 0.000000e+00 : f32
    %8 = vector.broadcast %cst_4 : f32 to vector<4x512xf32>
    %9 = arith.maximumf %7, %8 : vector<4x512xf32>
    %10 = arith.mulf %9, %9 : vector<4x512xf32>
    %11 = arith.truncf %10 : vector<4x512xf32> to vector<4x512xbf16>
    %cst_5 = arith.constant dense<0.000000e+00> : vector<4x128xf32>
    %12 = tpu.matmul %11, %1, %cst_5 {dimension_numbers = #tpu.dot_dimension_numbers<[1], [0], [0], [1], [0, 0, 1, 1], [], []>} : vector<4x512xbf16>, vector<512x128xbf16>, vector<4x128xf32> -> vector<4x128xf32>
    %13 = arith.index_cast %3 : i32 to index
    %c0_6 = arith.constant 0 : index
    %14 = vector.load %arg4[%13, %c0_6] : memref<4x128xf32, #tpu.memory_space<vmem>>, vector<4x128xf32>
    tpu.vector_store %arg4[%13, %c0_6], %12 {strides = array<i32>} : memref<4x128xf32, #tpu.memory_space<vmem>>, vector<4x128xf32>,
    %c1_i32 = arith.constant 1 : i32
    return
  }
  func.func @transform_0(%arg0: i32) -> (i32, i32) {
    %c0_i32 = arith.constant 0 : i32
    %c0_i32_0 = arith.constant 0 : i32
    return %arg0, %c0_i32 : i32, i32
  }
  func.func @transform_1(%arg0: i32) -> (i32, i32) {
    %c0_i32 = arith.constant 0 : i32
    %c0_i32_0 = arith.constant 0 : i32
    %c0_i32_1 = arith.constant 0 : i32
    return %c0_i32, %c0_i32_0 : i32, i32
  }
  func.func @transform_2(%arg0: i32) -> (i32, i32) {
    %c0_i32 = arith.constant 0 : i32
    %c0_i32_0 = arith.constant 0 : i32
    %c0_i32_1 = arith.constant 0 : i32
    return %c0_i32, %c0_i32_0 : i32, i32
  }
  func.func @transform_3(%arg0: i32) -> (i32, i32) {
    %c0_i32 = arith.constant 0 : i32
    %c0_i32_0 = arith.constant 0 : i32
    return %arg0, %c0_i32 : i32, i32
  }
}

</mosaic_0001>

<bundles_post_ra>
// kernel: tpu_custom_call.1
= control target key start
LH: loop header
LB: loop body
LE: loop exit
PB: predicated region body
PF: predicated region fallthrough
CT: control target
= control target key end

     0   :  { %8 = vsyncpa [#allocation3], 0  ;;  %s1064_s0 = inlined_call_operand.hbm [shape: f32[4,128], index: 0, kind: input, shape index: {}]   ;;  %s1065_s1 = inlined_call_operand.hbm [shape: bf16[128,512], index: 1, kind: input, shape index: {}]   ;;  %s1066_s2 = inlined_call_operand.hbm [shape: bf16[512,128], index: 2, kind: input, shape index: {}]   ;;  %s1067_s3 = inlined_call_operand.hbm [shape: f32[4,128], index: 3, kind: output, shape index: {}]  }
   0x1   :  { %9 = vsyncpa [#allocation6], 0 }
   0x2   :  { %10 = vsyncpa [#allocation4], 0  ;;  %s987_s12 = smov [#allocation5]   ;;  %s893_s16 = scalar_lea.hbm %s1065_s1, 4096 }
   0x3   :  { %s26_s13 = sshll.u32 %s987_s12, 4  ;;  %p894_p0 = scmp.ne.s32.totalorder %s1065_s1, %s893_s16  ;;  %s27_s13 = int_to_ptr.vmem [resolvable:$true] %s26_s13 }
   0x4   :  { %p897_p1 = scmp.lt.u32.totalorder %s893_s16, %s1065_s1 }
   0x6   :  { %p899_p2 = pnand %p897_p1, %p894_p0 }
   0x8   :  { %902 = shalt.err (!%p899_p2)
}
   0x9   :  { %s903_s21 = scalar_lea.vmem %s27_s13, 4096  ;;  %p908_p4 = scmp.lt.s32.totalorder %s27_s13, %s27_s13 }
   0xa   :  { %p904_p3 = scmp.ne.s32.totalorder %s27_s13, %s903_s21  ;;  %p909_p5 = scmp.lt.s32.totalorder %s903_s21, %s903_s21 }
   0xc   :  { %p910_p6 = por %p909_p5, %p908_p4 }
   0xe   :  { %p911_p7 = pnand %p910_p6, %p904_p3 }
  0x10   :  { %914 = shalt.err (!%p911_p7)
}
  0x11   :  { %s988_s22 = smov 256   ;;  %s989_s23 = smov 16  }
  0x12   :  { %32 = dma.hbm_to_vmem [thread:$0]  %s1065_s1, 4096, %s27_s13, [#allocation6], %s988_s22, %s988_s22, %s989_s23  }
  0x13   :  { %s990_s26 = smov [#allocation2]   ;;  %s991_s28 = smov [#allocation7]  }
  0x14   :  { %s17_s27 = sshll.u32 %s990_s26, 4  ;;  %s38_s29 = sshll.u32 %s991_s28, 4  ;;  %s18_s27 = int_to_ptr.vmem [resolvable:$true] %s17_s27  ;;  %s39_s29 = int_to_ptr.vmem [resolvable:$true] %s38_s29 }
  0x15   :  { %s915_s5 = scalar_lea.hbm %s1064_s0, 64 }
  0x16   :  { %p916_p8 = scmp.ne.s32.totalorder %s1064_s0, %s915_s5  ;;  %p919_p9 = scmp.lt.u32.totalorder %s915_s5, %s1064_s0 }
  0x18   :  { %p921_p10 = pnand %p919_p9, %p916_p8 }
  0x1a   :  { %924 = shalt.err (!%p921_p10)
}
  0x1b   :  { %s925_s1 = scalar_lea.vmem %s18_s27, 64  ;;  %p930_p12 = scmp.lt.s32.totalorder %s18_s27, %s18_s27 }
  0x1c   :  { %p926_p11 = scmp.ne.s32.totalorder %s18_s27, %s925_s1  ;;  %p931_p13 = scmp.lt.s32.totalorder %s925_s1, %s925_s1 }
  0x1e   :  { %p932_p0 = por %p931_p13, %p930_p12 }
  0x20   :  { %p933_p1 = pnand %p932_p0, %p926_p11 }
  0x22   :  { %936 = shalt.err (!%p933_p1)
}
  0x23   :  { %20 = dma.hbm_to_vmem [thread:$0]  %s1064_s0, 64, %s18_s27, [#allocation3]  }
  0x24   :  { %s937_s14 = scalar_lea.hbm %s1066_s2, 4096 }
  0x25   :  { %p938_p2 = scmp.ne.s32.totalorder %s1066_s2, %s937_s14  ;;  %p941_p3 = scmp.lt.u32.totalorder %s937_s14, %s1066_s2 }
  0x27   :  { %p943_p4 = pnand %p941_p3, %p938_p2 }
  0x29   :  { %946 = shalt.err (!%p943_p4)
}
  0x2a   :  { %s947_s19 = scalar_lea.vmem %s39_s29, 4096  ;;  %p952_p6 = scmp.lt.s32.totalorder %s39_s29, %s39_s29 }
  0x2b   :  { %p948_p5 = scmp.ne.s32.totalorder %s39_s29, %s947_s19  ;;  %p953_p7 = scmp.lt.s32.totalorder %s947_s19, %s947_s19 }
  0x2d   :  { %p954_p8 = por %p953_p7, %p952_p6 }
  0x2f   :  { %p955_p9 = pnand %p954_p8, %p948_p5 }
  0x31   :  { %958 = shalt.err (!%p955_p9)
}
  0x32   :  { %s992_s0 = smov 64   ;;  %s993_s20 = smov 4  }
  0x33   :  { %44 = dma.hbm_to_vmem [thread:$0]  %s1066_s2, 4096, %s39_s29, [#allocation6], %s992_s0, %s992_s0, %s993_s20  }
  0x34   :  { %981 = dma.done.wait [#allocation3], 64  }
  0x35   :  { %982 = vsyncadd [#allocation3], 4294967232 }
  0x36   :  { %983 = dma.done.wait [#allocation6], 8192  }
  0x37   :  { %984 = vsyncadd [#allocation6], 4294959104  ;;  %v994_v0 = vmov 0   ;;  %v813_v1 = vld [vmem:[#allocation5 + $0x4] ss:$16 sps:$4 sm:$0xff]   ;;  %v865_v39 = vld [vmem:[#allocation7 + $0x48] sm:$0xff]  }
  0x38   :  { %345 = vmatprep.mubr.bf16.mxu0 %v994_v0  ;;  %386 = vmatprep.mubr.bf16.mxu1 %v994_v0  ;;  %v815_v2 = vld [vmem:[#allocation5 + $0xc] ss:$16 sps:$4 sm:$0xff]   ;;  %v817_v3 = vld [vmem:[#allocation5] ss:$16 sps:$4 sm:$0xff]   ;;  %v818_v4 = vld [vmem:[#allocation5 + $0x8] ss:$16 sps:$4 sm:$0xff]  }
  0x39   :  { %313 = vmatprep.subr.bf16.mxu0 %v813_v1  ;;  %354 = vmatprep.subr.bf16.mxu1 %v815_v2  ;;  %v819_v5 = vld [vmem:[#allocation5 + $0x24] ss:$16 sps:$4 sm:$0xff]   ;;  %v821_v6 = vld [vmem:[#allocation5 + $0x2c] ss:$16 sps:$4 sm:$0xff]   ;;  %v823_v7 = vld [vmem:[#allocation5 + $0x20] ss:$16 sps:$4 sm:$0xff]  }
  0x3a   :  { %314 = vmatpush1.bf16.msra.mxu0 %v817_v3  ;;  %355 = vmatpush1.bf16.msra.mxu1 %v818_v4  ;;  %v824_v8 = vld [vmem:[#allocation5 + $0x28] ss:$16 sps:$4 sm:$0xff]   ;;  %v825_v9 = vld [vmem:[#allocation5 + $0x44] ss:$16 sps:$4 sm:$0xff]   ;;  %v827_v10 = vld [vmem:[#allocation5 + $0x4c] ss:$16 sps:$4 sm:$0xff]  }
  0x3b   :  { %315 = vmatprep.subr.bf16.mxu0 %v819_v5  ;;  %356 = vmatprep.subr.bf16.mxu1 %v821_v6  ;;  %v829_v11 = vld [vmem:[#allocation5 + $0x40] ss:$16 sps:$4 sm:$0xff]   ;;  %v830_v12 = vld [vmem:[#allocation5 + $0x48] ss:$16 sps:$4 sm:$0xff]   ;;  %v831_v13 = vld [vmem:[#allocation5 + $0x64] ss:$16 sps:$4 sm:$0xff]  }
  0x3c   :  { %v833_v14 = vld [vmem:[#allocation5 + $0x6c] ss:$16 sps:$4 sm:$0xff]   ;;  %v835_v15 = vld [vmem:[#allocation5 + $0x60] ss:$16 sps:$4 sm:$0xff]   ;;  %v836_v16 = vld [vmem:[#allocation5 + $0x68] ss:$16 sps:$4 sm:$0xff]  }
  0x3d   :  { %v837_v17 = vld [vmem:[#allocation5 + $0x84] ss:$16 sps:$4 sm:$0xff]   ;;  %v839_v18 = vld [vmem:[#allocation5 + $0x8c] ss:$16 sps:$4 sm:$0xff]   ;;  %v841_v19 = vld [vmem:[#allocation5 + $0x80] ss:$16 sps:$4 sm:$0xff]  }
  0x3e   :  { %316 = vmatpush1.bf16.msra.mxu0 %v823_v7  ;;  %357 = vmatpush1.bf16.msra.mxu1 %v824_v8  ;;  %v842_v20 = vld [vmem:[#allocation5 + $0x88] ss:$16 sps:$4 sm:$0xff]   ;;  %v843_v21 = vld [vmem:[#allocation5 + $0xa4] ss:$16 sps:$4 sm:$0xff]   ;;  %v845_v22 = vld [vmem:[#allocation5 + $0xac] ss:$16 sps:$4 sm:$0xff]  }
  0x3f   :  { %317 = vmatprep.subr.bf16.mxu0 %v825_v9  ;;  %358 = vmatprep.subr.bf16.mxu1 %v827_v10  ;;  %v847_v23 = vld [vmem:[#allocation5 + $0xa0] ss:$16 sps:$4 sm:$0xff]   ;;  %v848_v24 = vld [vmem:[#allocation5 + $0xa8] ss:$16 sps:$4 sm:$0xff]   ;;  %v849_v25 = vld [vmem:[#allocation5 + $0xc4] ss:$16 sps:$4 sm:$0xff]  }
  0x40   :  { %v851_v26 = vld [vmem:[#allocation5 + $0xcc] ss:$16 sps:$4 sm:$0xff]   ;;  %v853_v27 = vld [vmem:[#allocation5 + $0xc0] ss:$16 sps:$4 sm:$0xff]   ;;  %v854_v28 = vld [vmem:[#allocation5 + $0xc8] ss:$16 sps:$4 sm:$0xff]  }
  0x41   :  { %v855_v29 = vld [vmem:[#allocation5 + $0xe4] ss:$16 sps:$4 sm:$0xff]   ;;  %v857_v30 = vld [vmem:[#allocation5 + $0xec] ss:$16 sps:$4 sm:$0xff]   ;;  %v859_v31 = vld [vmem:[#allocation5 + $0xe0] ss:$16 sps:$4 sm:$0xff]  }
  0x42   :  { %318 = vmatpush1.bf16.msra.mxu0 %v829_v11  ;;  %359 = vmatpush1.bf16.msra.mxu1 %v830_v12  ;;  %v860_v32 = vld [vmem:[#allocation5 + $0xe8] ss:$16 sps:$4 sm:$0xff]   ;;  %v151_v33 = vld [vmem:[#allocation2] sm:$0xf]  ;;  %v861_v34 = vld [vmem:[#allocation7 + $0x40] sm:$0xff]   ;;  %s995_s2 = smov [#allocation8]  }
  0x43   :  { %319 = vmatprep.subr.bf16.mxu0 %v831_v13  ;;  %360 = vmatprep.subr.bf16.mxu1 %v833_v14  ;;  %v862_v35 = vld [vmem:[#allocation7 + $0xc0] sm:$0xff]   ;;  %v152_v37 = vpack.c.bf16 %v151_v33, %v151_v33  ;;  %v866_v40 = vld [vmem:[#allocation7 + $0xc8] sm:$0xff]   ;;  %v869_v43 = vld [vmem:[#allocation7 + $0x50] sm:$0xff]   ;;  %s686_s23 = sshll.u32 %s995_s2, 4  ;;  %s687_s23 = int_to_ptr.vmem [resolvable:$true] %s686_s23 }
  0x44   :  { %v863_v36 = vld [vmem:[#allocation7] sm:$0xff]   ;;  %v867_v41 = vld [vmem:[#allocation7 + $0x8] sm:$0xff]   ;;  %v870_v44 = vld [vmem:[#allocation7 + $0xd0] sm:$0xff]   ;;  %s959_s24 = scalar_lea.vmem %s687_s23, 64  ;;  %p964_p11 = scmp.lt.s32.totalorder %s687_s23, %s687_s23 }
  0x45   :  { %v864_v38 = vld [vmem:[#allocation7 + $0x80] sm:$0xff]   ;;  %v868_v42 = vld [vmem:[#allocation7 + $0x88] sm:$0xff]   ;;  %v871_v45 = vld [vmem:[#allocation7 + $0x10] sm:$0xff]   ;;  %p960_p10 = scmp.ne.s32.totalorder %s687_s23, %s959_s24  ;;  %p965_p12 = scmp.lt.s32.totalorder %s959_s24, %s959_s24 }
  0x46   :  { %320 = vmatpush1.bf16.msra.mxu0 %v835_v15  ;;  %361 = vmatpush1.bf16.msra.mxu1 %v836_v16  ;;  %v872_v46 = vld [vmem:[#allocation7 + $0x90] sm:$0xff]   ;;  %v873_v47 = vld [vmem:[#allocation7 + $0x58] sm:$0xff]   ;;  %v877_v51 = vld [vmem:[#allocation7 + $0x60] sm:$0xff]  }
  0x47   :  { %321 = vmatprep.subr.bf16.mxu0 %v837_v17  ;;  %362 = vmatprep.subr.bf16.mxu1 %v839_v18  ;;  %v874_v48 = vld [vmem:[#allocation7 + $0xd8] sm:$0xff]   ;;  %v878_v52 = vld [vmem:[#allocation7 + $0xe0] sm:$0xff]   ;;  %v881_v55 = vld [vmem:[#allocation7 + $0x68] sm:$0xff]   ;;  %p966_p13 = por %p965_p12, %p964_p11 }
  0x48   :  { %v875_v49 = vld [vmem:[#allocation7 + $0x18] sm:$0xff]   ;;  %v879_v53 = vld [vmem:[#allocation7 + $0x20] sm:$0xff]   ;;  %v882_v56 = vld [vmem:[#allocation7 + $0xe8] sm:$0xff]  }
  0x49   :  { %v876_v50 = vld [vmem:[#allocation7 + $0x98] sm:$0xff]   ;;  %v880_v54 = vld [vmem:[#allocation7 + $0xa0] sm:$0xff]   ;;  %v883_v57 = vld [vmem:[#allocation7 + $0x28] sm:$0xff]   ;;  %p967_p0 = pnand %p966_p13, %p960_p10 }
  0x4a   :  { %322 = vmatpush1.bf16.msra.mxu0 %v841_v19  ;;  %363 = vmatpush1.bf16.msra.mxu1 %v842_v20  ;;  %v884_v58 = vld [vmem:[#allocation7 + $0xa8] sm:$0xff]   ;;  %v885_v59 = vld [vmem:[#allocation7 + $0x70] sm:$0xff]   ;;  %v889_v63 = vld [vmem:[#allocation7 + $0x78] sm:$0xff]  }
  0x4b   :  { %323 = vmatprep.subr.bf16.mxu0 %v843_v21  ;;  %364 = vmatprep.subr.bf16.mxu1 %v845_v22  ;;  %v886_v60 = vld [vmem:[#allocation7 + $0xf0] sm:$0xff]   ;;  %v890_v0 = vld [vmem:[#allocation7 + $0xf8] sm:$0xff]  }
  0x4c   :  { %v887_v61 = vld [vmem:[#allocation7 + $0x30] sm:$0xff]   ;;  %v891_v1 = vld [vmem:[#allocation7 + $0x38] sm:$0xff]  }
  0x4d   :  { %v888_v62 = vld [vmem:[#allocation7 + $0xb0] sm:$0xff]   ;;  %v892_v2 = vld [vmem:[#allocation7 + $0xb8] sm:$0xff]  }
  0x4e   :  { %324 = vmatpush1.bf16.msra.mxu0 %v847_v23  ;;  %365 = vmatpush1.bf16.msra.mxu1 %v848_v24 }
  0x4f   :  { %325 = vmatprep.subr.bf16.mxu0 %v849_v25  ;;  %366 = vmatprep.subr.bf16.mxu1 %v851_v26 }
  0x52   :  { %326 = vmatpush1.bf16.msra.mxu0 %v853_v27  ;;  %367 = vmatpush1.bf16.msra.mxu1 %v854_v28 }
  0x53   :  { %327 = vmatprep.subr.bf16.mxu0 %v855_v29  ;;  %368 = vmatprep.subr.bf16.mxu1 %v857_v30 }
  0x56   :  { %328 = vmatpush1.bf16.msra.mxu0 %v859_v31  ;;  %369 = vmatpush1.bf16.msra.mxu1 %v860_v32 }
  0x57   :  { %760 = vmatprep.subr.bf16.mxu0 %v861_v34  ;;  %782 = vmatprep.subr.bf16.mxu1 %v862_v35 }
  0x59   :  { %346 = vmatmul.mubr.bf16.vlgmr.msra.gmra.mrb[0].mxu0 %v152_v37  ;;  %387 = vmatmul.mubr.bf16.vlgmr.msra.gmra.mrb[0].mxu1 %v152_v37 }
  0x5a   :  { %761 = vmatpush3.bf16.msra.mxu0 %v863_v36  ;;  %783 = vmatpush3.bf16.msra.mxu1 %v864_v38 }
  0x5b   :  { %762 = vmatprep.subr.bf16.mxu0 %v865_v39  ;;  %784 = vmatprep.subr.bf16.mxu1 %v866_v40 }
  0x5e   :  { %763 = vmatpush3.bf16.msra.mxu0 %v867_v41  ;;  %785 = vmatpush3.bf16.msra.mxu1 %v868_v42 }
  0x5f   :  { %764 = vmatprep.subr.bf16.mxu0 %v869_v43  ;;  %786 = vmatprep.subr.bf16.mxu1 %v870_v44 }
  0x62   :  { %765 = vmatpush3.bf16.msra.mxu0 %v871_v45  ;;  %787 = vmatpush3.bf16.msra.mxu1 %v872_v46 }
  0x63   :  { %766 = vmatprep.subr.bf16.mxu0 %v873_v47  ;;  %788 = vmatprep.subr.bf16.mxu1 %v874_v48 }
  0x66   :  { %767 = vmatpush3.bf16.msra.mxu0 %v875_v49  ;;  %789 = vmatpush3.bf16.msra.mxu1 %v876_v50 }
  0x67   :  { %768 = vmatprep.subr.bf16.mxu0 %v877_v51  ;;  %790 = vmatprep.subr.bf16.mxu1 %v878_v52 }
  0x6a   :  { %769 = vmatpush3.bf16.msra.mxu0 %v879_v53  ;;  %791 = vmatpush3.bf16.msra.mxu1 %v880_v54 }
  0x6b   :  { %770 = vmatprep.subr.bf16.mxu0 %v881_v55  ;;  %792 = vmatprep.subr.bf16.mxu1 %v882_v56 }
  0x6e   :  { %771 = vmatpush3.bf16.msra.mxu0 %v883_v57  ;;  %793 = vmatpush3.bf16.msra.mxu1 %v884_v58 }
  0x6f   :  { %772 = vmatprep.subr.bf16.mxu0 %v885_v59  ;;  %794 = vmatprep.subr.bf16.mxu1 %v886_v60 }
  0x72   :  { %773 = vmatpush3.bf16.msra.mxu0 %v887_v61  ;;  %795 = vmatpush3.bf16.msra.mxu1 %v888_v62 }
  0x73   :  { %774 = vmatprep.subr.bf16.mxu0 %v889_v63  ;;  %796 = vmatprep.subr.bf16.mxu1 %v890_v0 }
  0x76   :  { %775 = vmatpush3.bf16.msra.mxu0 %v891_v1  ;;  %797 = vmatpush3.bf16.msra.mxu1 %v892_v2 }
 0x12c   :  { %v347_v3 = vpop.f32.mrb[0].mxu0  ;;  %v388_v4 = vpop.f32.mrb[0].mxu1 }
 0x12d   :  { %v395_v5 = vmax.f32 %v347_v3, 0.0  ;;  %v397_v6 = vmax.f32 %v388_v4, 0.0  ;;  %v349_v7 = vpop.f32.mrb[1].mxu0  ;;  %v390_v8 = vpop.f32.mrb[1].mxu1 }
 0x12e   :  { %v396_v9 = vmax.f32 %v349_v7, 0.0  ;;  %v398_v10 = vmax.f32 %v390_v8, 0.0  ;;  %v351_v11 = vpop.f32.mrb[2].mxu0  ;;  %v392_v12 = vpop.f32.mrb[2].mxu1 }
 0x12f   :  { %v399_v13 = vmul.f32 %v395_v5, %v395_v5  ;;  %v401_v14 = vmul.f32 %v397_v6, %v397_v6  ;;  %v352_v15 = vpop.f32.mrb[3].mxu0  ;;  %v393_v16 = vpop.f32.mrb[3].mxu1 }
 0x130   :  { %v400_v17 = vmul.f32 %v396_v9, %v396_v9  ;;  %v402_v18 = vmul.f32 %v398_v10, %v398_v10 }
 0x131   :  { %v403_v21 = vpack.c.bf16 %v399_v13, %v399_v13  ;;  %v405_v22 = vpack.c.bf16 %v401_v14, %v401_v14 }
 0x132   :  { %v404_v19 = vpack.c.bf16 %v400_v17, %v400_v17  ;;  %v406_v20 = vpack.c.bf16 %v402_v18, %v402_v18 }
 0x134   :  { %631 = vmatprep.mubr.bf16.mxu0 %v404_v19  ;;  %671 = vmatprep.mubr.bf16.mxu1 %v406_v20 }
 0x135   :  { %632 = vmatmul.mubr.bf16.vlgmr.msra.gmra.mrb[4].mxu0 %v403_v21  ;;  %672 = vmatmul.mubr.bf16.vlgmr.msra.gmra.mrb[4].mxu1 %v405_v22 }
 0x208   :  { %v776_v23 = vpop.f32.mrb[4].mxu0  ;;  %v798_v24 = vpop.f32.mrb[4].mxu1 }
 0x209   :  { %v777_v25 = vpop.f32.mrb[5].mxu0  ;;  %v799_v26 = vpop.f32.mrb[5].mxu1 }
 0x20a   :  { %v778_v27 = vadd.f32 %v777_v25, %v776_v23  ;;  %v800_v28 = vadd.f32 %v799_v26, %v798_v24  ;;  %v779_v29 = vpop.f32.mrb[6].mxu0  ;;  %v801_v30 = vpop.f32.mrb[6].mxu1 }
 0x20b   :  { %v780_v31 = vpop.f32.mrb[7].mxu0  ;;  %v802_v32 = vpop.f32.mrb[7].mxu1 }
 0x20c   :  { %v674_v33 = vadd.f32 %v800_v28, %v778_v27 }
 0x20e   :  { %679 = vst [vmem:[#allocation8] sm:$0xf] %v674_v33 }
 0x20f   :  { %970 = shalt.err (!%p967_p0)
}
 0x210   :  { %s971_s27 = scalar_lea.hbm %s1067_s3, 64 }
 0x211   :  { %p972_p1 = scmp.ne.s32.totalorder %s1067_s3, %s971_s27  ;;  %p975_p2 = scmp.lt.u32.totalorder %s971_s27, %s1067_s3 }
 0x213   :  { %p977_p3 = pnand %p975_p2, %p972_p1 }
 0x215   :  { %980 = shalt.err (!%p977_p3)
}
 0x216   :  { %689 = dma.vmem_to_hbm [thread:$0]  %s687_s23, 64, %s1067_s3, [#allocation4]  }
 0x217   :  { %985 = dma.done.wait [#allocation4], 64  }
 0x218   :  { %986 = vsyncadd [#allocation4], 4294967232 }
 0x219   :  { %693 = vsyncpa [#allocation3], 1 }
 0x21a   :  { %694 = vsyncpa [#allocation6], 1 }
 0x21b   :  { %695 = vsyncpa [#allocation4], 1 }

</bundles_post_ra>
